<compile_context>
chip_gen: v6e
topology: v6e:2x2x1
jax: 0.10.0
libtpu: 0.0.40
codegen_flags: <defaults>
</compile_context>

<pallas_src>
import jax
import jax.numpy as jnp
from jax.experimental import pallas as pl
from jax.experimental.pallas import tpu as pltpu


def _round_up(x, m):
    return ((x + m - 1) // m) * m


def _ae_kernel(x_ref, *refs):
    """One batch tile of decoder(encoder(x)).

    ReLU after encoder L1-L3 and decoder L1-L3 only; encoder L4 (the latent)
    and decoder L4 (the reconstruction) have no activation.
    """
    (w1, b1, w2, b2, w3, b3, w4, b4,
     w5, b5, w6, b6, w7, b7, w8, b8, out_ref) = refs

    def linear(h, w_ref, b_ref, relu):
        # bf16 x bf16 on the MXU with f32 accumulation; bias/ReLU in f32.
        y = jnp.dot(h.astype(jnp.bfloat16), w_ref[...],
                    preferred_element_type=jnp.float32) + b_ref[...]
        return jnp.maximum(y, 0.0) if relu else y

    h = x_ref[...]                      # (TILE_B, input_size), f32

    # ----- encoder -----
    h = linear(h, w1, b1, relu=True)    # input_size -> h_dim
    h = linear(h, w2, b2, relu=True)    # h_dim      -> h_dim // 2
    h = linear(h, w3, b3, relu=True)    # h_dim // 2 -> z_dim * 2
    h = linear(h, w4, b4, relu=False)   # z_dim * 2  -> z_dim      (encoded)

    # ----- decoder -----
    h = linear(h, w5, b5, relu=True)    # z_dim      -> z_dim * 2
    h = linear(h, w6, b6, relu=True)    # z_dim * 2  -> h_dim // 2
    h = linear(h, w7, b7, relu=True)    # h_dim // 2 -> h_dim
    h = linear(h, w8, b8, relu=False)   # h_dim      -> encode_size (decoded)

    out_ref[...] = h.astype(out_ref.dtype)


def ae_forward(x, params, *, tile_b=128):
    """params: flat list [w1, b1, ..., w8, b8]; w_i: (in, out) bf16, b_i: (1, out) f32."""
    batch, input_size = x.shape
    encode_size = params[-1].shape[-1]
    out_dtype = x.dtype

    # Batch tile: multiple of 8 sublanes, capped at 128 MXU rows.
    tile_b = max(8, min(tile_b, _round_up(batch, 8)))
    padded_batch = _round_up(batch, tile_b)
    if padded_batch != batch:
        x = jnp.pad(x, ((0, padded_batch - batch), (0, 0)))

    grid = (pl.cdiv(padded_batch, tile_b),)

    # x / out stream through the pipeline; weights & biases are resident
    # (constant index_map -> DMA'd once, reused every grid step).
    x_spec = pl.BlockSpec((tile_b, input_size), lambda i: (i, 0))
    param_specs = [pl.BlockSpec(p.shape, lambda i: (0, 0)) for p in params]
    out_spec = pl.BlockSpec((tile_b, encode_size), lambda i: (i, 0))

    flops = 2 * padded_batch * sum(w.shape[0] * w.shape[1] for w in params[::2])
    bytes_accessed = (
        padded_batch * input_size * x.dtype.itemsize
        + padded_batch * encode_size * jnp.dtype(out_dtype).itemsize
        + sum(int(p.size) * p.dtype.itemsize for p in params)
    )

    out = pl.pallas_call(
        _ae_kernel,
        out_shape=jax.ShapeDtypeStruct((padded_batch, encode_size), out_dtype),
        grid=grid,
        in_specs=[x_spec] + param_specs,
        out_specs=out_spec,
        compiler_params=pltpu.CompilerParams(
            dimension_semantics=("parallel",),
            vmem_limit_bytes=64 * 1024 * 1024,
        ),
        cost_estimate=pl.CostEstimate(
            flops=int(flops),
            transcendentals=0,
            bytes_accessed=int(bytes_accessed),
        ),
    )(x, *params)

    return out[:batch]


def init_ae_params(key, input_size, encode_size, h_dim=128, z_dim=20):
    """Deterministic synthetic parameters matching the AE layer shapes.

    Weights are returned in bf16 (MXU-native); biases in f32.
    """
    dims = [
        (input_size, h_dim),        # enc L1
        (h_dim, h_dim // 2),        # enc L2
        (h_dim // 2, z_dim * 2),    # enc L3
        (z_dim * 2, z_dim),         # enc L4
        (z_dim, z_dim * 2),         # dec L1
        (z_dim * 2, h_dim // 2),    # dec L2
        (h_dim // 2, h_dim),        # dec L3
        (h_dim, encode_size),       # dec L4
    ]
    params = []
    for (fan_in, fan_out) in dims:
        key, kw, kb = jax.random.split(key, 3)
        scale = 1.0 / jnp.sqrt(jnp.float32(fan_in))
        w = jax.random.uniform(kw, (fan_in, fan_out), jnp.float32, -scale, scale)
        b = jax.random.uniform(kb, (1, fan_out), jnp.float32, -scale, scale)
        params += [w.astype(jnp.bfloat16), b]
    return params


def ae_reference(x, params):
    """Plain-JAX reference computing the identical bf16-operand / f32-accum math."""
    h = x
    for i in range(8):
        w, b = params[2 * i], params[2 * i + 1]
        h = jnp.dot(h.astype(jnp.bfloat16), w,
                    preferred_element_type=jnp.float32) + b
        if i not in (3, 7):  # no ReLU after encoder L4 / decoder L4
            h = jnp.maximum(h, 0.0)
    return h


if __name__ == "__main__":
    # Module defaults: h_dim=128, z_dim=20. Batch chosen to exercise the batch
    # grid and the partial-tile padding path (200 -> padded to 256, 2 tiles).
    batch, input_size, encode_size = 200, 32, 32
    h_dim, z_dim = 128, 20

    key = jax.random.PRNGKey(0)
    key, kx = jax.random.split(key)
    x = jax.random.normal(kx, (batch, input_size), jnp.float32)
    params = init_ae_params(key, input_size, encode_size, h_dim=h_dim, z_dim=z_dim)

    out = ae_forward(x, params)
    out = jax.block_until_ready(out)

    ref = ae_reference(x, params)
    assert out.shape == (batch, encode_size)
    assert jnp.allclose(out, ref, atol=1e-3, rtol=1e-3), "mismatch vs reference"

    print("KERNEL_OK")
</pallas_src>

<mosaic_0001>
module attributes {stable_mosaic.version = 11 : i64} {
  func.func @_ae_kernel(%arg0: i32, %arg1: memref<128x32xf32, #tpu.memory_space<vmem>>, %arg2: memref<32x128xbf16, #tpu.memory_space<vmem>>, %arg3: memref<1x128xf32, #tpu.memory_space<vmem>>, %arg4: memref<128x64xbf16, #tpu.memory_space<vmem>>, %arg5: memref<1x64xf32, #tpu.memory_space<vmem>>, %arg6: memref<64x40xbf16, #tpu.memory_space<vmem>>, %arg7: memref<1x40xf32, #tpu.memory_space<vmem>>, %arg8: memref<40x20xbf16, #tpu.memory_space<vmem>>, %arg9: memref<1x20xf32, #tpu.memory_space<vmem>>, %arg10: memref<20x40xbf16, #tpu.memory_space<vmem>>, %arg11: memref<1x40xf32, #tpu.memory_space<vmem>>, %arg12: memref<40x64xbf16, #tpu.memory_space<vmem>>, %arg13: memref<1x64xf32, #tpu.memory_space<vmem>>, %arg14: memref<64x128xbf16, #tpu.memory_space<vmem>>, %arg15: memref<1x128xf32, #tpu.memory_space<vmem>>, %arg16: memref<128x32xbf16, #tpu.memory_space<vmem>>, %arg17: memref<1x32xf32, #tpu.memory_space<vmem>>, %arg18: memref<128x32xf32, #tpu.memory_space<vmem>>) attributes {dimension_semantics = [#tpu.dimension_semantics<parallel>], iteration_bounds = array<i64: 2>, scalar_prefetch = 0 : i64, scratch_operands = 0 : i64, tpu.core_type = #tpu.core_type<tc>, window_params = [{transform_indices = @transform_0, window_bounds = array<i64: 128, 32>}, {pipeline_mode = #tpu.pipeline_mode<synchronous>, transform_indices = @transform_1, window_bounds = array<i64: 32, 128>}, {pipeline_mode = #tpu.pipeline_mode<synchronous>, transform_indices = @transform_2, window_bounds = array<i64: 1, 128>}, {pipeline_mode = #tpu.pipeline_mode<synchronous>, transform_indices = @transform_3, window_bounds = array<i64: 128, 64>}, {pipeline_mode = #tpu.pipeline_mode<synchronous>, transform_indices = @transform_4, window_bounds = array<i64: 1, 64>}, {pipeline_mode = #tpu.pipeline_mode<synchronous>, transform_indices = @transform_5, window_bounds = array<i64: 64, 40>}, {pipeline_mode = #tpu.pipeline_mode<synchronous>, transform_indices = @transform_6, window_bounds = array<i64: 1, 40>}, {pipeline_mode = #tpu.pipeline_mode<synchronous>, transform_indices = @transform_7, window_bounds = array<i64: 40, 20>}, {pipeline_mode = #tpu.pipeline_mode<synchronous>, transform_indices = @transform_8, window_bounds = array<i64: 1, 20>}, {pipeline_mode = #tpu.pipeline_mode<synchronous>, transform_indices = @transform_9, window_bounds = array<i64: 20, 40>}, {pipeline_mode = #tpu.pipeline_mode<synchronous>, transform_indices = @transform_10, window_bounds = array<i64: 1, 40>}, {pipeline_mode = #tpu.pipeline_mode<synchronous>, transform_indices = @transform_11, window_bounds = array<i64: 40, 64>}, {pipeline_mode = #tpu.pipeline_mode<synchronous>, transform_indices = @transform_12, window_bounds = array<i64: 1, 64>}, {pipeline_mode = #tpu.pipeline_mode<synchronous>, transform_indices = @transform_13, window_bounds = array<i64: 64, 128>}, {pipeline_mode = #tpu.pipeline_mode<synchronous>, transform_indices = @transform_14, window_bounds = array<i64: 1, 128>}, {pipeline_mode = #tpu.pipeline_mode<synchronous>, transform_indices = @transform_15, window_bounds = array<i64: 128, 32>}, {pipeline_mode = #tpu.pipeline_mode<synchronous>, transform_indices = @transform_16, window_bounds = array<i64: 1, 32>}, {transform_indices = @transform_17, window_bounds = array<i64: 128, 32>}]} {
    %c0 = arith.constant 0 : index
    %c0_0 = arith.constant 0 : index
    %0 = vector.load %arg1[%c0, %c0_0] : memref<128x32xf32, #tpu.memory_space<vmem>>, vector<128x32xf32>
    %1 = arith.truncf %0 : vector<128x32xf32> to vector<128x32xbf16>
    %c0_1 = arith.constant 0 : index
    %c0_2 = arith.constant 0 : index
    %2 = vector.load %arg2[%c0_1, %c0_2] : memref<32x128xbf16, #tpu.memory_space<vmem>>, vector<32x128xbf16>
    %cst = arith.constant dense<0.000000e+00> : vector<128x128xf32>
    %3 = tpu.matmul %1, %2, %cst {dimension_numbers = #tpu.dot_dimension_numbers<[1], [0], [0], [1], [0, 0, 1, 1], [], []>} : vector<128x32xbf16>, vector<32x128xbf16>, vector<128x128xf32> -> vector<128x128xf32>
    %c0_3 = arith.constant 0 : index
    %c0_4 = arith.constant 0 : index
    %4 = vector.load %arg3[%c0_3, %c0_4] : memref<1x128xf32, #tpu.memory_space<vmem>>, vector<1x128xf32>
    %5 = vector.broadcast %4 : vector<1x128xf32> to vector<128x128xf32>
    %6 = arith.addf %3, %5 : vector<128x128xf32>
    %cst_5 = arith.constant 0.000000e+00 : f32
    %7 = vector.broadcast %cst_5 : f32 to vector<128x128xf32>
    %8 = arith.maximumf %6, %7 : vector<128x128xf32>
    %9 = arith.truncf %8 : vector<128x128xf32> to vector<128x128xbf16>
    %c0_6 = arith.constant 0 : index
    %c0_7 = arith.constant 0 : index
    %10 = vector.load %arg4[%c0_6, %c0_7] : memref<128x64xbf16, #tpu.memory_space<vmem>>, vector<128x64xbf16>
    %cst_8 = arith.constant dense<0.000000e+00> : vector<128x64xf32>
    %11 = tpu.matmul %9, %10, %cst_8 {dimension_numbers = #tpu.dot_dimension_numbers<[1], [0], [0], [1], [0, 0, 1, 1], [], []>} : vector<128x128xbf16>, vector<128x64xbf16>, vector<128x64xf32> -> vector<128x64xf32>
    %c0_9 = arith.constant 0 : index
    %c0_10 = arith.constant 0 : index
    %12 = vector.load %arg5[%c0_9, %c0_10] : memref<1x64xf32, #tpu.memory_space<vmem>>, vector<1x64xf32>
    %13 = vector.broadcast %12 : vector<1x64xf32> to vector<128x64xf32>
    %14 = arith.addf %11, %13 : vector<128x64xf32>
    %cst_11 = arith.constant 0.000000e+00 : f32
    %15 = vector.broadcast %cst_11 : f32 to vector<128x64xf32>
    %16 = arith.maximumf %14, %15 : vector<128x64xf32>
    %17 = arith.truncf %16 : vector<128x64xf32> to vector<128x64xbf16>
    %c0_12 = arith.constant 0 : index
    %c0_13 = arith.constant 0 : index
    %18 = vector.load %arg6[%c0_12, %c0_13] : memref<64x40xbf16, #tpu.memory_space<vmem>>, vector<64x40xbf16>
    %cst_14 = arith.constant dense<0.000000e+00> : vector<128x40xf32>
    %19 = tpu.matmul %17, %18, %cst_14 {dimension_numbers = #tpu.dot_dimension_numbers<[1], [0], [0], [1], [0, 0, 1, 1], [], []>} : vector<128x64xbf16>, vector<64x40xbf16>, vector<128x40xf32> -> vector<128x40xf32>
    %c0_15 = arith.constant 0 : index
    %c0_16 = arith.constant 0 : index
    %20 = vector.load %arg7[%c0_15, %c0_16] : memref<1x40xf32, #tpu.memory_space<vmem>>, vector<1x40xf32>
    %21 = vector.broadcast %20 : vector<1x40xf32> to vector<128x40xf32>
    %22 = arith.addf %19, %21 : vector<128x40xf32>
    %cst_17 = arith.constant 0.000000e+00 : f32
    %23 = vector.broadcast %cst_17 : f32 to vector<128x40xf32>
    %24 = arith.maximumf %22, %23 : vector<128x40xf32>
    %25 = arith.truncf %24 : vector<128x40xf32> to vector<128x40xbf16>
    %c0_18 = arith.constant 0 : index
    %c0_19 = arith.constant 0 : index
    %26 = vector.load %arg8[%c0_18, %c0_19] : memref<40x20xbf16, #tpu.memory_space<vmem>>, vector<40x20xbf16>
    %cst_20 = arith.constant dense<0.000000e+00> : vector<128x20xf32>
    %27 = tpu.matmul %25, %26, %cst_20 {dimension_numbers = #tpu.dot_dimension_numbers<[1], [0], [0], [1], [0, 0, 1, 1], [], []>} : vector<128x40xbf16>, vector<40x20xbf16>, vector<128x20xf32> -> vector<128x20xf32>
    %c0_21 = arith.constant 0 : index
    %c0_22 = arith.constant 0 : index
    %28 = vector.load %arg9[%c0_21, %c0_22] : memref<1x20xf32, #tpu.memory_space<vmem>>, vector<1x20xf32>
    %29 = vector.broadcast %28 : vector<1x20xf32> to vector<128x20xf32>
    %30 = arith.addf %27, %29 : vector<128x20xf32>
    %31 = arith.truncf %30 : vector<128x20xf32> to vector<128x20xbf16>
    %c0_23 = arith.constant 0 : index
    %c0_24 = arith.constant 0 : index
    %32 = vector.load %arg10[%c0_23, %c0_24] : memref<20x40xbf16, #tpu.memory_space<vmem>>, vector<20x40xbf16>
    %cst_25 = arith.constant dense<0.000000e+00> : vector<128x40xf32>
    %33 = tpu.matmul %31, %32, %cst_25 {dimension_numbers = #tpu.dot_dimension_numbers<[1], [0], [0], [1], [0, 0, 1, 1], [], []>} : vector<128x20xbf16>, vector<20x40xbf16>, vector<128x40xf32> -> vector<128x40xf32>
    %c0_26 = arith.constant 0 : index
    %c0_27 = arith.constant 0 : index
    %34 = vector.load %arg11[%c0_26, %c0_27] : memref<1x40xf32, #tpu.memory_space<vmem>>, vector<1x40xf32>
    %35 = vector.broadcast %34 : vector<1x40xf32> to vector<128x40xf32>
    %36 = arith.addf %33, %35 : vector<128x40xf32>
    %cst_28 = arith.constant 0.000000e+00 : f32
    %37 = vector.broadcast %cst_28 : f32 to vector<128x40xf32>
    %38 = arith.maximumf %36, %37 : vector<128x40xf32>
    %39 = arith.truncf %38 : vector<128x40xf32> to vector<128x40xbf16>
    %c0_29 = arith.constant 0 : index
    %c0_30 = arith.constant 0 : index
    %40 = vector.load %arg12[%c0_29, %c0_30] : memref<40x64xbf16, #tpu.memory_space<vmem>>, vector<40x64xbf16>
    %cst_31 = arith.constant dense<0.000000e+00> : vector<128x64xf32>
    %41 = tpu.matmul %39, %40, %cst_31 {dimension_numbers = #tpu.dot_dimension_numbers<[1], [0], [0], [1], [0, 0, 1, 1], [], []>} : vector<128x40xbf16>, vector<40x64xbf16>, vector<128x64xf32> -> vector<128x64xf32>
    %c0_32 = arith.constant 0 : index
    %c0_33 = arith.constant 0 : index
    %42 = vector.load %arg13[%c0_32, %c0_33] : memref<1x64xf32, #tpu.memory_space<vmem>>, vector<1x64xf32>
    %43 = vector.broadcast %42 : vector<1x64xf32> to vector<128x64xf32>
    %44 = arith.addf %41, %43 : vector<128x64xf32>
    %cst_34 = arith.constant 0.000000e+00 : f32
    %45 = vector.broadcast %cst_34 : f32 to vector<128x64xf32>
    %46 = arith.maximumf %44, %45 : vector<128x64xf32>
    %47 = arith.truncf %46 : vector<128x64xf32> to vector<128x64xbf16>
    %c0_35 = arith.constant 0 : index
    %c0_36 = arith.constant 0 : index
    %48 = vector.load %arg14[%c0_35, %c0_36] : memref<64x128xbf16, #tpu.memory_space<vmem>>, vector<64x128xbf16>
    %cst_37 = arith.constant dense<0.000000e+00> : vector<128x128xf32>
    %49 = tpu.matmul %47, %48, %cst_37 {dimension_numbers = #tpu.dot_dimension_numbers<[1], [0], [0], [1], [0, 0, 1, 1], [], []>} : vector<128x64xbf16>, vector<64x128xbf16>, vector<128x128xf32> -> vector<128x128xf32>
    %c0_38 = arith.constant 0 : index
    %c0_39 = arith.constant 0 : index
    %50 = vector.load %arg15[%c0_38, %c0_39] : memref<1x128xf32, #tpu.memory_space<vmem>>, vector<1x128xf32>
    %51 = vector.broadcast %50 : vector<1x128xf32> to vector<128x128xf32>
    %52 = arith.addf %49, %51 : vector<128x128xf32>
    %cst_40 = arith.constant 0.000000e+00 : f32
    %53 = vector.broadcast %cst_40 : f32 to vector<128x128xf32>
    %54 = arith.maximumf %52, %53 : vector<128x128xf32>
    %55 = arith.truncf %54 : vector<128x128xf32> to vector<128x128xbf16>
    %c0_41 = arith.constant 0 : index
    %c0_42 = arith.constant 0 : index
    %56 = vector.load %arg16[%c0_41, %c0_42] : memref<128x32xbf16, #tpu.memory_space<vmem>>, vector<128x32xbf16>
    %cst_43 = arith.constant dense<0.000000e+00> : vector<128x32xf32>
    %57 = tpu.matmul %55, %56, %cst_43 {dimension_numbers = #tpu.dot_dimension_numbers<[1], [0], [0], [1], [0, 0, 1, 1], [], []>} : vector<128x128xbf16>, vector<128x32xbf16>, vector<128x32xf32> -> vector<128x32xf32>
    %c0_44 = arith.constant 0 : index
    %c0_45 = arith.constant 0 : index
    %58 = vector.load %arg17[%c0_44, %c0_45] : memref<1x32xf32, #tpu.memory_space<vmem>>, vector<1x32xf32>
    %59 = vector.broadcast %58 : vector<1x32xf32> to vector<128x32xf32>
    %60 = arith.addf %57, %59 : vector<128x32xf32>
    %c0_46 = arith.constant 0 : index
    %c0_47 = arith.constant 0 : index
    %61 = vector.load %arg18[%c0_46, %c0_47] : memref<128x32xf32, #tpu.memory_space<vmem>>, vector<128x32xf32>
    tpu.vector_store %arg18[%c0_46, %c0_47], %60 {strides = array<i32>} : memref<128x32xf32, #tpu.memory_space<vmem>>, vector<128x32xf32>,
    return
  }
  func.func @transform_0(%arg0: i32) -> (i32, i32) {
    %c0_i32 = arith.constant 0 : i32
    %c0_i32_0 = arith.constant 0 : i32
    return %arg0, %c0_i32 : i32, i32
  }
  func.func @transform_1(%arg0: i32) -> (i32, i32) {
    %c0_i32 = arith.constant 0 : i32
    %c0_i32_0 = arith.constant 0 : i32
    %c0_i32_1 = arith.constant 0 : i32
    return %c0_i32, %c0_i32_0 : i32, i32
  }
  func.func @transform_2(%arg0: i32) -> (i32, i32) {
    %c0_i32 = arith.constant 0 : i32
    %c0_i32_0 = arith.constant 0 : i32
    %c0_i32_1 = arith.constant 0 : i32
    return %c0_i32, %c0_i32_0 : i32, i32
  }
  func.func @transform_3(%arg0: i32) -> (i32, i32) {
    %c0_i32 = arith.constant 0 : i32
    %c0_i32_0 = arith.constant 0 : i32
    %c0_i32_1 = arith.constant 0 : i32
    return %c0_i32, %c0_i32_0 : i32, i32
  }
  func.func @transform_4(%arg0: i32) -> (i32, i32) {
    %c0_i32 = arith.constant 0 : i32
    %c0_i32_0 = arith.constant 0 : i32
    %c0_i32_1 = arith.constant 0 : i32
    return %c0_i32, %c0_i32_0 : i32, i32
  }
  func.func @transform_5(%arg0: i32) -> (i32, i32) {
    %c0_i32 = arith.constant 0 : i32
    %c0_i32_0 = arith.constant 0 : i32
    %c0_i32_1 = arith.constant 0 : i32
    return %c0_i32, %c0_i32_0 : i32, i32
  }
  func.func @transform_6(%arg0: i32) -> (i32, i32) {
    %c0_i32 = arith.constant 0 : i32
    %c0_i32_0 = arith.constant 0 : i32
    %c0_i32_1 = arith.constant 0 : i32
    return %c0_i32, %c0_i32_0 : i32, i32
  }
  func.func @transform_7(%arg0: i32) -> (i32, i32) {
    %c0_i32 = arith.constant 0 : i32
    %c0_i32_0 = arith.constant 0 : i32
    %c0_i32_1 = arith.constant 0 : i32
    return %c0_i32, %c0_i32_0 : i32, i32
  }
  func.func @transform_8(%arg0: i32) -> (i32, i32) {
    %c0_i32 = arith.constant 0 : i32
    %c0_i32_0 = arith.constant 0 : i32
    %c0_i32_1 = arith.constant 0 : i32
    return %c0_i32, %c0_i32_0 : i32, i32
  }
  func.func @transform_9(%arg0: i32) -> (i32, i32) {
    %c0_i32 = arith.constant 0 : i32
    %c0_i32_0 = arith.constant 0 : i32
    %c0_i32_1 = arith.constant 0 : i32
    return %c0_i32, %c0_i32_0 : i32, i32
  }
  func.func @transform_10(%arg0: i32) -> (i32, i32) {
    %c0_i32 = arith.constant 0 : i32
    %c0_i32_0 = arith.constant 0 : i32
    %c0_i32_1 = arith.constant 0 : i32
    return %c0_i32, %c0_i32_0 : i32, i32
  }
  func.func @transform_11(%arg0: i32) -> (i32, i32) {
    %c0_i32 = arith.constant 0 : i32
    %c0_i32_0 = arith.constant 0 : i32
    %c0_i32_1 = arith.constant 0 : i32
    return %c0_i32, %c0_i32_0 : i32, i32
  }
  func.func @transform_12(%arg0: i32) -> (i32, i32) {
    %c0_i32 = arith.constant 0 : i32
    %c0_i32_0 = arith.constant 0 : i32
    %c0_i32_1 = arith.constant 0 : i32
    return %c0_i32, %c0_i32_0 : i32, i32
  }
  func.func @transform_13(%arg0: i32) -> (i32, i32) {
    %c0_i32 = arith.constant 0 : i32
    %c0_i32_0 = arith.constant 0 : i32
    %c0_i32_1 = arith.constant 0 : i32
    return %c0_i32, %c0_i32_0 : i32, i32
  }
  func.func @transform_14(%arg0: i32) -> (i32, i32) {
    %c0_i32 = arith.constant 0 : i32
    %c0_i32_0 = arith.constant 0 : i32
    %c0_i32_1 = arith.constant 0 : i32
    return %c0_i32, %c0_i32_0 : i32, i32
  }
  func.func @transform_15(%arg0: i32) -> (i32, i32) {
    %c0_i32 = arith.constant 0 : i32
    %c0_i32_0 = arith.constant 0 : i32
    %c0_i32_1 = arith.constant 0 : i32
    return %c0_i32, %c0_i32_0 : i32, i32
  }
  func.func @transform_16(%arg0: i32) -> (i32, i32) {
    %c0_i32 = arith.constant 0 : i32
    %c0_i32_0 = arith.constant 0 : i32
    %c0_i32_1 = arith.constant 0 : i32
    return %c0_i32, %c0_i32_0 : i32, i32
  }
  func.func @transform_17(%arg0: i32) -> (i32, i32) {
    %c0_i32 = arith.constant 0 : i32
    %c0_i32_0 = arith.constant 0 : i32
    return %arg0, %c0_i32 : i32, i32
  }
}

</mosaic_0001>

<bundles_post_ra>
// kernel: tpu_custom_call.1
= control target key start
LH: loop header
LB: loop body
LE: loop exit
PB: predicated region body
PF: predicated region fallthrough
CT: control target
= control target key end

     0   :  { %s2606_s24 = smov 0   ;;  %s2860_s0 = inlined_call_operand.vmem [shape: f32[256,32], index: 0, kind: input, shape index: {}]   ;;  %s2861_s1 = inlined_call_operand.vmem [shape: bf16[32,128], index: 1, kind: input, shape index: {}]   ;;  %s2862_s2 = inlined_call_operand.vmem [shape: f32[1,128], index: 2, kind: input, shape index: {}]   ;;  %s2863_s3 = inlined_call_operand.vmem [shape: bf16[128,64], index: 3, kind: input, shape index: {}]   ;;  %s2864_s4 = inlined_call_operand.vmem [shape: f32[1,64], index: 4, kind: input, shape index: {}]   ;;  %s2865_s5 = inlined_call_operand.vmem [shape: bf16[64,40], index: 5, kind: input, shape index: {}]   ;;  %s2866_s6 = inlined_call_operand.vmem [shape: f32[1,40], index: 6, kind: input, shape index: {}]   ;;  %s2867_s7 = inlined_call_operand.vmem [shape: bf16[40,20], index: 7, kind: input, shape index: {}]   ;;  %s2868_s8 = inlined_call_operand.vmem [shape: f32[1,20], index: 8, kind: input, shape index: {}]   ;;  %s2869_s9 = inlined_call_operand.vmem [shape: bf16[20,40], index: 9, kind: input, shape index: {}]   ;;  %s2870_s10 = inlined_call_operand.vmem [shape: f32[1,40], index: 10, kind: input, shape index: {}]   ;;  %s2871_s11 = inlined_call_operand.vmem [shape: bf16[40,64], index: 11, kind: input, shape index: {}]   ;;  %s2872_s12 = inlined_call_operand.vmem [shape: f32[1,64], index: 12, kind: input, shape index: {}]   ;;  %s2873_s13 = inlined_call_operand.vmem [shape: bf16[64,128], index: 13, kind: input, shape index: {}]   ;;  %s2874_s14 = inlined_call_operand.vmem [shape: f32[1,128], index: 14, kind: input, shape index: {}]   ;;  %s2875_s15 = inlined_call_operand.vmem [shape: bf16[128,32], index: 15, kind: input, shape index: {}]   ;;  %s2876_s16 = inlined_call_operand.vmem [shape: f32[1,32], index: 16, kind: input, shape index: {}]   ;;  %s2877_s17 = inlined_call_operand.vmem [shape: f32[256,32], index: 17, kind: output, shape index: {}]  }
   0x1   :  { %2879 = sst [smem:[#allocation2_spill]] %s2860_s0 }
   0x2   :  { %2880 = sst [smem:[#allocation3_spill]] %s2861_s1 }
   0x3 LB: > { %s2052_s25 = sadd.s32 4294967295, %s2514_s24   ;;  %p2056_p0 = scmp.ge.s32.totalorder %s2514_s24, 1  ;;  %s2514_s24 = sphi %s2606_s24, %s27_s24  }
   0x4   : > { %p488_p1 = scmp.lt.s32.totalorder %s2514_s24, 3 }
   0x6   : > { %p489_p2 = pnand %p2056_p0, %p488_p1 }
   0x7   : > { %s2881_s28 = sld [smem:[#allocation3_spill]] (!%p489_p2)  ;;  %s2057_s29 = sshll.u32 (!%p489_p2), %s2052_s25, 4 }
   0x8   : > { %492 = sbr.rel (%p489_p2) target bundleno = 1688 (0x698), region = 88  ;;  %p541_p3 = scmp.lt.s32.totalorder (!%p489_p2), %s2057_s29, 31 }
   0x9   : > { %s2882_s25 = sld [smem:[#allocation2_spill]] (!%p489_p2) }
   0xd   : > { %v2474_v0 = vld [vmem:[%s2881_s28 + $0x8] sm:$0xff]   ;;  %v2475_v1 = vld [vmem:[%s2881_s28] sm:$0xff]   ;;  %v2476_v2 = vld [vmem:[%s2863_s3 + $0x38] sm:$0xff]   ;;  %s2884_s29 = smov (!%p541_p3, %s2057_s29), 31  ;;  %vm600_vm0 = vcmask 261120   ;;  %vm1175_vm1 = vcmask 1043456  }
   0xe   : > { %2251 = vmatprep.subr.bf16.mxu0 %v2474_v0  ;;  %v2477_v3 = vld [vmem:[%s2863_s3 + $0x30] sm:$0xff]   ;;  %2447 = vmatprep.subr.bf16.mxu1 %v2476_v2  ;;  %s2058_s21 = sshll.u32 %s2884_s29, 3  ;;  %v2478_v4 = vld [vmem:[%s2863_s3 + $0x28] sm:$0xff]   ;;  %v2479_v14 = vld [vmem:[%s2863_s3 + $0x20] sm:$0xff]   ;;  %vm977_vm2 = vcmask 523264   ;;  %vm1328_vm3 = vcmask 1041408  }
   0xf   : > { %2252 = vmatpush3.bf16.msra.mxu0 %v2474_v0  ;;  %2455 = vmatpush3.bf16.msra.mxu1 %v2476_v2  ;;  %s2634_s26 = scalar_lea.vmem %s2882_s25, %s2058_s21  ;;  %v2480_v19 = vld [vmem:[%s2863_s3 + $0x18] sm:$0xff]   ;;  %v2481_v31 = vld [vmem:[%s2863_s3 + $0x10] sm:$0xff]   ;;  %v2482_v32 = vld [vmem:[%s2863_s3 + $0x8] sm:$0xff]   ;;  %vm1150_vm4 = vcmask 326656   ;;  %vm1303_vm5 = vcmask 162816   ;;  %s2823_s0 = scalar_lea.vmem %s2877_s17, %s2058_s21 }
  0x10   : > { %2253 = vmatprep.subr.bf16.mxu0 %v2475_v1  ;;  %2448 = vmatprep.subr.bf16.mxu1 %v2477_v3  ;;  %v553_v5 = vld [vmem:[%s2634_s26] sm:$0xff]  ;;  %v554_v6 = vld [vmem:[%s2634_s26 + $0x8] sm:$0xff]  ;;  %v555_v7 = vld [vmem:[%s2634_s26 + $0x10] sm:$0xff] }
  0x11   : > { %v569_v8 = vpack.c.bf16 %v554_v6, %v553_v5  ;;  %v556_v9 = vld [vmem:[%s2634_s26 + $0x18] sm:$0xff]  ;;  %v557_v10 = vld [vmem:[%s2634_s26 + $0x20] sm:$0xff]  ;;  %v558_v11 = vld [vmem:[%s2634_s26 + $0x28] sm:$0xff] }
  0x12   : > { %v570_v12 = vpack.c.bf16 %v556_v9, %v555_v7  ;;  %v571_v13 = vpack.c.bf16 %v558_v11, %v557_v10  ;;  %v559_v15 = vld [vmem:[%s2634_s26 + $0x30] sm:$0xff]  ;;  %v560_v16 = vld [vmem:[%s2634_s26 + $0x38] sm:$0xff]  ;;  %v561_v17 = vld [vmem:[%s2634_s26 + $0x40] sm:$0xff] }
  0x13   : > { %2254 = vmatpush3.bf16.msra.mxu0 %v2475_v1  ;;  %2456 = vmatpush3.bf16.msra.mxu1 %v2477_v3  ;;  %v562_v18 = vld [vmem:[%s2634_s26 + $0x48] sm:$0xff]  ;;  %v572_v20 = vpack.c.bf16 %v560_v16, %v559_v15  ;;  %v563_v22 = vld [vmem:[%s2634_s26 + $0x50] sm:$0xff]  ;;  %v564_v23 = vld [vmem:[%s2634_s26 + $0x58] sm:$0xff] }
  0x14   : > { %2271 = vmatprep.subr.bf16.mxu0 %v2476_v2  ;;  %2255 = vmatprep.mubr.msk.bf16.mxu0 %vm600_vm0, %v569_v8  ;;  %v573_v21 = vpack.c.bf16 %v562_v18, %v561_v17  ;;  %v565_v24 = vld [vmem:[%s2634_s26 + $0x60] sm:$0xff]  ;;  %v566_v25 = vld [vmem:[%s2634_s26 + $0x68] sm:$0xff]  ;;  %v574_v26 = vpack.c.bf16 %v564_v23, %v563_v22  ;;  %v567_v28 = vld [vmem:[%s2634_s26 + $0x70] sm:$0xff] }
  0x15   : > { %2449 = vmatprep.subr.bf16.mxu1 %v2478_v4  ;;  %v575_v27 = vpack.c.bf16 %v566_v25, %v565_v24  ;;  %v568_v29 = vld [vmem:[%s2634_s26 + $0x78] sm:$0xff]  ;;  %v2483_v33 = vld [vmem:[%s2863_s3] sm:$0xff]  }
  0x16   : > { %2256 = vmatmul.mubr.msk.bf16.vlgmr.msra.gmra.mxu0 %vm600_vm0, %v570_v12  ;;  %v576_v30 = vpack.c.bf16 %v568_v29, %v567_v28  ;;  %v2484_v34 = vld [vmem:[%s2865_s5 + $0x18] sm:$0xff]   ;;  %v2061_v37 = vld [vmem:[%s2862_s2] ss:$0 sm:$0xff]  ;;  %v2485_v28 = vld [vmem:[%s2865_s5 + $0x10] sm:$0xff]  }
  0x17   : > { %2259 = vmatprep.mubr.msk.bf16.mxu0 %vm600_vm0, %v571_v13  ;;  %2272 = vmatpush3.bf16.msra.mxu0 %v2476_v2  ;;  %v2486_v29 = vld [vmem:[%s2865_s5 + $0x8] sm:$0xff]  }
  0x18   : > { %2273 = vmatprep.subr.bf16.mxu0 %v2477_v3  ;;  %2457 = vmatpush3.bf16.msra.mxu1 %v2478_v4 }
  0x19   : > { %2450 = vmatprep.subr.bf16.mxu1 %v2479_v14 }
  0x1b   : > { %2274 = vmatpush3.bf16.msra.mxu0 %v2477_v3 }
  0x1c   : > { %2275 = vmatprep.subr.bf16.mxu0 %v2478_v4  ;;  %2458 = vmatpush3.bf16.msra.mxu1 %v2479_v14 }
  0x1d   : > { %2451 = vmatprep.subr.bf16.mxu1 %v2480_v19 }
  0x1e   : > { %2260 = vmatmul.mubr.msk.bf16.gmra.mxu0 %vm600_vm0, %v572_v20 }
  0x1f   : > { %2263 = vmatprep.mubr.msk.bf16.mxu0 %vm600_vm0, %v573_v21  ;;  %2276 = vmatpush3.bf16.msra.mxu0 %v2478_v4 }
  0x20   : > { %2277 = vmatprep.subr.bf16.mxu0 %v2479_v14  ;;  %2459 = vmatpush3.bf16.msra.mxu1 %v2480_v19 }
  0x21   : > { %2452 = vmatprep.subr.bf16.mxu1 %v2481_v31 }
  0x23   : > { %2278 = vmatpush3.bf16.msra.mxu0 %v2479_v14 }
  0x24   : > { %2279 = vmatprep.subr.bf16.mxu0 %v2480_v19  ;;  %2460 = vmatpush3.bf16.msra.mxu1 %v2481_v31 }
  0x25   : > { %2453 = vmatprep.subr.bf16.mxu1 %v2482_v32 }
  0x26   : > { %2264 = vmatmul.mubr.msk.bf16.gmra.mxu0 %vm600_vm0, %v574_v26 }
  0x27   : > { %2267 = vmatprep.mubr.msk.bf16.mxu0 %vm600_vm0, %v575_v27  ;;  %2280 = vmatpush3.bf16.msra.mxu0 %v2480_v19 }
  0x28   : > { %2281 = vmatprep.subr.bf16.mxu0 %v2481_v31  ;;  %2461 = vmatpush3.bf16.msra.mxu1 %v2482_v32 }
  0x29   : > { %2454 = vmatprep.subr.bf16.mxu1 %v2483_v33 }
  0x2b   : > { %2282 = vmatpush3.bf16.msra.mxu0 %v2481_v31  ;;  %v2488_v31 = vld [vmem:[%s2867_s7 + $0x10] ss:$0 sps:$4 sm:$0xff]  }
  0x2c   : > { %2283 = vmatprep.subr.bf16.mxu0 %v2482_v32  ;;  %2462 = vmatpush3.bf16.msra.mxu1 %v2483_v33 }
  0x2d   : > { %2463 = vmatprep.subr.msk.bf16.mxu1 %vm1175_vm1, %v2488_v31 }
  0x2e   : > { %2268 = vmatmul.mubr.msk.bf16.gmra.mxu0 %vm600_vm0, %v576_v30  ;;  %v2487_v30 = vld [vmem:[%s2865_s5] sm:$0xff]  }
  0x2f   : > { %2284 = vmatpush3.bf16.msra.mxu0 %v2482_v32  ;;  %v1177_v32 = vsel %vm1175_vm1, %v2488_v31, 0 }
  0x30   : > { %2285 = vmatprep.subr.bf16.mxu0 %v2483_v33 }
  0x33   : > { %2286 = vmatpush3.bf16.msra.mxu0 %v2483_v33 }
  0x34   : > { %2303 = vmatprep.subr.bf16.mxu0 %v2484_v34 }
  0xd6   : > { %v2257_v35 = vpop.f32.mrf.mxu0 }
  0xd7   : > { %v668_v41 = vadd.f32 %v2257_v35, %v2061_v37  ;;  %v2072_v35 = vld [vmem:[%s2864_s4] ss:$0 sm:$0xff] }
  0xd8   : > { %v659_v36 = vpop.f32.mrf.mxu0 }
  0xd9   : > { %v660_v39 = vadd.f32 %v2061_v37, %v659_v36  ;;  %v724_v48 = vmax.f32 %v668_v41, 0.0 }
  0xda   : > { %v2258_v38 = vpop.f32.mrf.mxu0 }
  0xdb   : > { %v671_v40 = vadd.f32 %v2258_v38, %v2061_v37  ;;  %v722_v46 = vmax.f32 %v660_v39, 0.0 }
  0xdc   : > { %v662_v42 = vpop.f32.mrf.mxu0 }
  0xdd   : > { %v663_v43 = vadd.f32 %v2061_v37, %v662_v42  ;;  %v725_v44 = vmax.f32 %v671_v40, 0.0 }
  0xde   : > { %v2261_v45 = vpop.f32.mrf.mxu0 }
  0xdf   : > { %v723_v47 = vmax.f32 %v663_v43, 0.0  ;;  %v739_v51 = vpack.c.bf16 %v725_v44, %v724_v48  ;;  %v684_v55 = vadd.f32 %v2261_v45, %v2061_v37 }
  0xe0   : > { %v675_v49 = vpop.f32.mrf.mxu0 }
  0xe1   : > { %v738_v50 = vpack.c.bf16 %v723_v47, %v722_v46  ;;  %v676_v53 = vadd.f32 %v2061_v37, %v675_v49  ;;  %v728_v62 = vmax.f32 %v684_v55, 0.0 }
  0xe2   : > { %v2262_v52 = vpop.f32.mrf.mxu0 }
  0xe3   : > { %v687_v54 = vadd.f32 %v2262_v52, %v2061_v37  ;;  %2287 = vmatprep.mubr.bf16.mxu0 %v738_v50  ;;  %v726_v60 = vmax.f32 %v676_v53, 0.0 }
  0xe4   : > { %v678_v56 = vpop.f32.mrf.mxu0  ;;  %2288 = vmatmul.mubr.bf16.vlgmr.msra.gmra.mxu0 %v739_v51 }
  0xe5   : > { %v679_v57 = vadd.f32 %v2061_v37, %v678_v56  ;;  %2304 = vmatpush3.bf16.msra.mxu0 %v2484_v34  ;;  %v729_v58 = vmax.f32 %v687_v54, 0.0 }
  0xe6   : > { %v2265_v59 = vpop.f32.mrf.mxu0  ;;  %2305 = vmatprep.subr.bf16.mxu0 %v2485_v28 }
  0xe7   : > { %v727_v61 = vmax.f32 %v679_v57, 0.0  ;;  %v741_v1 = vpack.c.bf16 %v729_v58, %v728_v62  ;;  %v700_v5 = vadd.f32 %v2265_v59, %v2061_v37 }
  0xe8   : > { %v691_v63 = vpop.f32.mrf.mxu0 }
  0xe9   : > { %v740_v0 = vpack.c.bf16 %v727_v61, %v726_v60  ;;  %v692_v3 = vadd.f32 %v2061_v37, %v691_v63  ;;  %v732_v12 = vmax.f32 %v700_v5, 0.0  ;;  %2306 = vmatpush3.bf16.msra.mxu0 %v2485_v28  ;;  %v2491_v28 = vld [vmem:[%s2869_s9 + $0x8] ss:$0 sps:$4 sm:$0x33]  }
  0xea   : > { %v2266_v2 = vpop.f32.mrf.mxu0  ;;  %2307 = vmatprep.subr.bf16.mxu0 %v2486_v29 }
  0xeb   : > { %v703_v4 = vadd.f32 %v2266_v2, %v2061_v37  ;;  %2291 = vmatprep.mubr.bf16.mxu0 %v740_v0  ;;  %v730_v10 = vmax.f32 %v692_v3, 0.0 }
  0xec   : > { %v694_v6 = vpop.f32.mrf.mxu0  ;;  %2292 = vmatmul.mubr.bf16.gmra.mxu0 %v741_v1 }
  0xed   : > { %v695_v7 = vadd.f32 %v2061_v37, %v694_v6  ;;  %v733_v8 = vmax.f32 %v703_v4, 0.0  ;;  %2308 = vmatpush3.bf16.msra.mxu0 %v2486_v29  ;;  %v2492_v29 = vld [vmem:[%s2869_s9] sm:$0xff]  }
  0xee   : > { %v2269_v9 = vpop.f32.mrf.mxu0  ;;  %2309 = vmatprep.subr.bf16.mxu0 %v2487_v30 }
  0xef   : > { %v731_v11 = vmax.f32 %v695_v7, 0.0  ;;  %v743_v15 = vpack.c.bf16 %v733_v8, %v732_v12  ;;  %v716_v19 = vadd.f32 %v2269_v9, %v2061_v37 }
  0xf0   : > { %v707_v13 = vpop.f32.mrf.mxu0 }
  0xf1   : > { %v742_v14 = vpack.c.bf16 %v731_v11, %v730_v10  ;;  %v708_v17 = vadd.f32 %v2061_v37, %v707_v13  ;;  %v736_v25 = vmax.f32 %v716_v19, 0.0  ;;  %2310 = vmatpush3.bf16.msra.mxu0 %v2487_v30  ;;  %v1330_v30 = vsel %vm1328_vm3, %v2491_v28, 0 }
  0xf2   : > { %v2270_v16 = vpop.f32.mrf.mxu0  ;;  %2464 = vmatprep.subr.msk.bf16.mxu0 %vm1328_vm3, %v2491_v28 }
  0xf3   : > { %v719_v18 = vadd.f32 %v2270_v16, %v2061_v37  ;;  %2295 = vmatprep.mubr.bf16.mxu1 %v742_v14  ;;  %v734_v23 = vmax.f32 %v708_v17, 0.0 }
  0xf4   : > { %v710_v20 = vpop.f32.mrf.mxu0  ;;  %2296 = vmatmul.mubr.bf16.vlgmr.msra.gmra.mxu1 %v743_v15 }
  0xf5   : > { %v711_v21 = vadd.f32 %v2061_v37, %v710_v20  ;;  %v737_v22 = vmax.f32 %v719_v18, 0.0  ;;  %2328 = vmatpush3.bf16.msra.mxu1 %v1177_v32 }
  0xf7   : > { %v735_v24 = vmax.f32 %v711_v21, 0.0  ;;  %v745_v27 = vpack.c.bf16 %v737_v22, %v736_v25 }
  0xf9   : > { %v744_v26 = vpack.c.bf16 %v735_v24, %v734_v23 }
  0xfb   : > { %2299 = vmatprep.mubr.bf16.mxu1 %v744_v26  ;;  %v2489_v26 = vld [vmem:[%s2867_s7 + $0x8] sm:$0xff]  }
  0xfc   : > { %2300 = vmatmul.mubr.bf16.gmra.mxu1 %v745_v27  ;;  %2329 = vmatprep.subr.bf16.mxu1 %v2489_v26  ;;  %v2490_v27 = vld [vmem:[%s2867_s7] sm:$0xff]  }
  0xfd   : > { %2330 = vmatpush3.bf16.msra.mxu1 %v2489_v26 }
  0xfe   : > { %2331 = vmatprep.subr.bf16.mxu1 %v2490_v27 }
 0x101   : > { %2332 = vmatpush3.bf16.msra.mxu1 %v2490_v27 }
 0x1a4   : > { %v2289_v33 = vpop.f32.mrf.mxu0 }
 0x1a5   : > { %v860_v39 = vadd.f32 %v2289_v33, %v2072_v35  ;;  %v2081_v33 = vld [vmem:[%s2866_s6] ss:$0 sm:$0xff] }
 0x1a6   : > { %v851_v34 = vpop.f32.mrf.mxu0 }
 0x1a7   : > { %v852_v37 = vadd.f32 %v2072_v35, %v851_v34  ;;  %v916_v46 = vmax.f32 %v860_v39, 0.0 }
 0x1a8   : > { %v2290_v36 = vpop.f32.mrf.mxu0 }
 0x1a9   : > { %v863_v38 = vadd.f32 %v2290_v36, %v2072_v35  ;;  %v914_v44 = vmax.f32 %v852_v37, 0.0 }
 0x1aa   : > { %v854_v40 = vpop.f32.mrf.mxu0 }
 0x1ab   : > { %v855_v41 = vadd.f32 %v2072_v35, %v854_v40  ;;  %v917_v42 = vmax.f32 %v863_v38, 0.0 }
 0x1ac   : > { %v2293_v43 = vpop.f32.mrf.mxu0 }
 0x1ad   : > { %v915_v45 = vmax.f32 %v855_v41, 0.0  ;;  %v931_v49 = vpack.c.bf16 %v917_v42, %v916_v46  ;;  %v876_v53 = vadd.f32 %v2293_v43, %v2072_v35 }
 0x1ae   : > { %v867_v47 = vpop.f32.mrf.mxu0 }
 0x1af   : > { %v930_v48 = vpack.c.bf16 %v915_v45, %v914_v44  ;;  %v868_v51 = vadd.f32 %v2072_v35, %v867_v47  ;;  %v920_v60 = vmax.f32 %v876_v53, 0.0 }
 0x1b0   : > { %v2294_v50 = vpop.f32.mrf.mxu0 }
 0x1b1   : > { %v879_v52 = vadd.f32 %v2294_v50, %v2072_v35  ;;  %2311 = vmatprep.mubr.msk.bf16.mxu0 %vm977_vm2, %v930_v48  ;;  %v918_v58 = vmax.f32 %v868_v51, 0.0 }
 0x1b2   : > { %v870_v54 = vpop.f32.mrf.mxu0  ;;  %2312 = vmatmul.mubr.msk.bf16.vlgmr.msra.gmra.mxu0 %vm977_vm2, %v931_v49 }
 0x1b3   : > { %v871_v55 = vadd.f32 %v2072_v35, %v870_v54  ;;  %v921_v56 = vmax.f32 %v879_v52, 0.0  ;;  %2350 = vmatpush3.bf16.msra.mxu0 %v1330_v30  ;;  %v2094_v30 = vld [vmem:[%s2868_s8] ss:$0 sm:$0xff] }
 0x1b4   : > { %v2297_v57 = vpop.f32.mrf.mxu1  ;;  %2351 = vmatprep.subr.bf16.mxu0 %v2492_v29 }
 0x1b5   : > { %v919_v59 = vmax.f32 %v871_v55, 0.0  ;;  %v933_v63 = vpack.c.bf16 %v921_v56, %v920_v60  ;;  %v892_v3 = vadd.f32 %v2297_v57, %v2072_v35 }
 0x1b6   : > { %v883_v61 = vpop.f32.mrf.mxu1 }
 0x1b7   : > { %v932_v62 = vpack.c.bf16 %v919_v59, %v918_v58  ;;  %v884_v1 = vadd.f32 %v2072_v35, %v883_v61  ;;  %v924_v10 = vmax.f32 %v892_v3, 0.0  ;;  %2352 = vmatpush3.bf16.msra.mxu0 %v2492_v29 }
 0x1b8   : > { %v2298_v0 = vpop.f32.mrf.mxu1 }
 0x1b9   : > { %v895_v2 = vadd.f32 %v2298_v0, %v2072_v35  ;;  %2315 = vmatprep.mubr.msk.bf16.mxu0 %vm977_vm2, %v932_v62  ;;  %v922_v8 = vmax.f32 %v884_v1, 0.0 }
 0x1ba   : > { %v886_v4 = vpop.f32.mrf.mxu1  ;;  %2316 = vmatmul.mubr.msk.bf16.gmra.mxu0 %vm977_vm2, %v933_v63 }
 0x1bb   : > { %v887_v5 = vadd.f32 %v2072_v35, %v886_v4  ;;  %v925_v6 = vmax.f32 %v895_v2, 0.0 }
 0x1bc   : > { %v2301_v7 = vpop.f32.mrf.mxu1 }
 0x1bd   : > { %v923_v9 = vmax.f32 %v887_v5, 0.0  ;;  %v935_v13 = vpack.c.bf16 %v925_v6, %v924_v10  ;;  %v908_v17 = vadd.f32 %v2301_v7, %v2072_v35 }
 0x1be   : > { %v899_v11 = vpop.f32.mrf.mxu1 }
 0x1bf   : > { %v934_v12 = vpack.c.bf16 %v923_v9, %v922_v8  ;;  %v900_v15 = vadd.f32 %v2072_v35, %v899_v11  ;;  %v928_v23 = vmax.f32 %v908_v17, 0.0 }
 0x1c0   : > { %v2302_v14 = vpop.f32.mrf.mxu1 }
 0x1c1   : > { %v911_v16 = vadd.f32 %v2302_v14, %v2072_v35  ;;  %2319 = vmatprep.mubr.msk.bf16.mxu0 %vm977_vm2, %v934_v12  ;;  %v926_v21 = vmax.f32 %v900_v15, 0.0 }
 0x1c2   : > { %v902_v18 = vpop.f32.mrf.mxu1  ;;  %2320 = vmatmul.mubr.msk.bf16.gmra.mxu0 %vm977_vm2, %v935_v13 }
 0x1c3   : > { %v903_v19 = vadd.f32 %v2072_v35, %v902_v18  ;;  %v929_v20 = vmax.f32 %v911_v16, 0.0 }
 0x1c5   : > { %v927_v22 = vmax.f32 %v903_v19, 0.0  ;;  %v937_v25 = vpack.c.bf16 %v929_v20, %v928_v23 }
 0x1c7   : > { %v936_v24 = vpack.c.bf16 %v927_v22, %v926_v21 }
 0x1c9   : > { %2323 = vmatprep.mubr.msk.bf16.mxu0 %vm977_vm2, %v936_v24  ;;  %v2493_v24 = vld [vmem:[%s2871_s11 + $0x10] ss:$0 sps:$4 sm:$0xff]  }
 0x1ca   : > { %2324 = vmatmul.mubr.msk.bf16.gmra.mxu0 %vm977_vm2, %v937_v25  ;;  %v2494_v25 = vld [vmem:[%s2871_s11 + $0x8] sm:$0xff]   ;;  %2465 = vmatprep.subr.msk.bf16.mxu1 %vm1175_vm1, %v2493_v24  ;;  %v1505_v26 = vsel %vm1175_vm1, %v2493_v24, 0 }
 0x272   : > { %v2313_v31 = vpop.f32.mrf.mxu0 }
 0x273   : > { %v1045_v37 = vadd.f32 %v2313_v31, %v2081_v33 }
 0x274   : > { %v1036_v32 = vpop.f32.mrf.mxu0 }
 0x275   : > { %v1037_v35 = vadd.f32 %v2081_v33, %v1036_v32  ;;  %v1101_v44 = vmax.f32 %v1045_v37, 0.0 }
 0x276   : > { %v2314_v34 = vpop.f32.mrf.mxu0 }
 0x277   : > { %v1048_v36 = vadd.f32 %v2314_v34, %v2081_v33  ;;  %v1099_v42 = vmax.f32 %v1037_v35, 0.0 }
 0x278   : > { %v1039_v38 = vpop.f32.mrf.mxu0 }
 0x279   : > { %v1040_v39 = vadd.f32 %v2081_v33, %v1039_v38  ;;  %v1102_v40 = vmax.f32 %v1048_v36, 0.0 }
 0x27a   : > { %v2317_v41 = vpop.f32.mrf.mxu0 }
 0x27b   : > { %v1100_v43 = vmax.f32 %v1040_v39, 0.0  ;;  %v1116_v47 = vpack.c.bf16 %v1102_v40, %v1101_v44  ;;  %v1061_v51 = vadd.f32 %v2317_v41, %v2081_v33 }
 0x27c   : > { %v1052_v45 = vpop.f32.mrf.mxu0 }
 0x27d   : > { %v1115_v46 = vpack.c.bf16 %v1100_v43, %v1099_v42  ;;  %v1053_v49 = vadd.f32 %v2081_v33, %v1052_v45  ;;  %v1105_v58 = vmax.f32 %v1061_v51, 0.0 }
 0x27e   : > { %v2318_v48 = vpop.f32.mrf.mxu0 }
 0x27f   : > { %v1064_v50 = vadd.f32 %v2318_v48, %v2081_v33  ;;  %2333 = vmatprep.mubr.msk.bf16.mxu1 %vm1150_vm4, %v1115_v46  ;;  %v1103_v56 = vmax.f32 %v1053_v49, 0.0 }
 0x280   : > { %v1055_v52 = vpop.f32.mrf.mxu0  ;;  %2334 = vmatmul.mubr.msk.bf16.vlgmr.msra.gmra.mxu1 %vm1150_vm4, %v1116_v47 }
 0x281   : > { %v1056_v53 = vadd.f32 %v2081_v33, %v1055_v52  ;;  %v1106_v54 = vmax.f32 %v1064_v50, 0.0  ;;  %2370 = vmatpush3.bf16.msra.mxu1 %v1505_v26 }
 0x282   : > { %v2321_v55 = vpop.f32.mrf.mxu0  ;;  %2371 = vmatprep.subr.bf16.mxu1 %v2494_v25 }
 0x283   : > { %v1104_v57 = vmax.f32 %v1056_v53, 0.0  ;;  %v1118_v61 = vpack.c.bf16 %v1106_v54, %v1105_v58  ;;  %v1077_v1 = vadd.f32 %v2321_v55, %v2081_v33 }
 0x284   : > { %v1068_v59 = vpop.f32.mrf.mxu0 }
 0x285   : > { %v1117_v60 = vpack.c.bf16 %v1104_v57, %v1103_v56  ;;  %v1069_v63 = vadd.f32 %v2081_v33, %v1068_v59  ;;  %v1109_v8 = vmax.f32 %v1077_v1, 0.0  ;;  %2372 = vmatpush3.bf16.msra.mxu1 %v2494_v25 }
 0x286   : > { %v2322_v62 = vpop.f32.mrf.mxu0 }
 0x287   : > { %v1080_v0 = vadd.f32 %v2322_v62, %v2081_v33  ;;  %2337 = vmatprep.mubr.msk.bf16.mxu1 %vm1150_vm4, %v1117_v60  ;;  %v1107_v6 = vmax.f32 %v1069_v63, 0.0 }
 0x288   : > { %v1071_v2 = vpop.f32.mrf.mxu0  ;;  %2338 = vmatmul.mubr.msk.bf16.gmra.mxu1 %vm1150_vm4, %v1118_v61 }
 0x289   : > { %v1072_v3 = vadd.f32 %v2081_v33, %v1071_v2  ;;  %v1110_v4 = vmax.f32 %v1080_v0, 0.0 }
 0x28a   : > { %v2325_v5 = vpop.f32.mrf.mxu0 }
 0x28b   : > { %v1108_v7 = vmax.f32 %v1072_v3, 0.0  ;;  %v1120_v11 = vpack.c.bf16 %v1110_v4, %v1109_v8  ;;  %v1093_v15 = vadd.f32 %v2325_v5, %v2081_v33  ;;  %v2495_v4 = vld [vmem:[%s2871_s11] sm:$0xff]   ;;  %v2496_v5 = vld [vmem:[%s2873_s13 + $0x18] sm:$0xff]  }
 0x28c   : > { %v1084_v9 = vpop.f32.mrf.mxu0  ;;  %2373 = vmatprep.subr.bf16.mxu1 %v2495_v4  ;;  %2391 = vmatprep.subr.bf16.mxu0 %v2496_v5 }
 0x28d   : > { %v1119_v10 = vpack.c.bf16 %v1108_v7, %v1107_v6  ;;  %v1085_v13 = vadd.f32 %v2081_v33, %v1084_v9  ;;  %v1113_v21 = vmax.f32 %v1093_v15, 0.0  ;;  %2374 = vmatpush3.bf16.msra.mxu1 %v2495_v4  ;;  %v2497_v6 = vld [vmem:[%s2873_s13 + $0x10] sm:$0xff]   ;;  %v2498_v7 = vld [vmem:[%s2873_s13 + $0x8] sm:$0xff]  }
 0x28e   : > { %v2326_v12 = vpop.f32.mrf.mxu0  ;;  %v2502_v4 = vld [vmem:[%s2875_s15 + $0x28] sm:$0xff]  }
 0x28f   : > { %v1096_v14 = vadd.f32 %v2326_v12, %v2081_v33  ;;  %2341 = vmatprep.mubr.msk.bf16.mxu1 %vm1150_vm4, %v1119_v10  ;;  %v1111_v19 = vmax.f32 %v1085_v13, 0.0  ;;  %v2106_v10 = vld [vmem:[%s2870_s10] ss:$0 sm:$0xff] }
 0x290   : > { %v1087_v16 = vpop.f32.mrf.mxu0  ;;  %2342 = vmatmul.mubr.msk.bf16.gmra.mxu1 %vm1150_vm4, %v1120_v11 }
 0x291   : > { %v1088_v17 = vadd.f32 %v2081_v33, %v1087_v16  ;;  %v1114_v18 = vmax.f32 %v1096_v14, 0.0 }
 0x293   : > { %v1112_v20 = vmax.f32 %v1088_v17, 0.0  ;;  %v1122_v23 = vpack.c.bf16 %v1114_v18, %v1113_v21 }
 0x295   : > { %v1121_v22 = vpack.c.bf16 %v1112_v20, %v1111_v19 }
 0x297   : > { %2345 = vmatprep.mubr.msk.bf16.mxu1 %vm1150_vm4, %v1121_v22 }
 0x298   : > { %2346 = vmatmul.mubr.msk.bf16.gmra.mxu1 %vm1150_vm4, %v1122_v23 }
 0x340   : > { %v2335_v27 = vpop.f32.mrf.mxu1 }
 0x341   : > { %v1222_v35 = vadd.f32 %v2335_v27, %v2094_v30 }
 0x342   : > { %v1213_v28 = vpop.f32.mrf.mxu1 }
 0x343   : > { %v1214_v33 = vadd.f32 %v2094_v30, %v1213_v28 }
 0x344   : > { %v2336_v29 = vpop.f32.mrf.mxu1 }
 0x345   : > { %v1225_v31 = vadd.f32 %v2336_v29, %v2094_v30 }
 0x346   : > { %v1216_v32 = vpop.f32.mrf.mxu1 }
 0x347   : > { %v1217_v34 = vadd.f32 %v2094_v30, %v1216_v32  ;;  %v1277_v38 = vpack.c.bf16 %v1225_v31, %v1222_v35 }
 0x348   : > { %v2339_v36 = vpop.f32.mrf.mxu1 }
 0x349   : > { %v1276_v37 = vpack.c.bf16 %v1217_v34, %v1214_v33  ;;  %v1238_v45 = vadd.f32 %v2339_v36, %v2094_v30 }
 0x34a   : > { %v1229_v39 = vpop.f32.mrf.mxu1 }
 0x34b   : > { %2353 = vmatprep.mubr.msk.bf16.mxu0 %vm1303_vm5, %v1276_v37  ;;  %v1230_v43 = vadd.f32 %v2094_v30, %v1229_v39 }
 0x34c   : > { %v2340_v40 = vpop.f32.mrf.mxu1  ;;  %2354 = vmatmul.mubr.msk.bf16.vlgmr.msra.gmra.mxu0 %vm1303_vm5, %v1277_v38 }
 0x34d   : > { %v1241_v41 = vadd.f32 %v2340_v40, %v2094_v30  ;;  %2392 = vmatpush3.bf16.msra.mxu0 %v2496_v5  ;;  %v2503_v5 = vld [vmem:[%s2875_s15 + $0x20] sm:$0xff]  }
 0x34e   : > { %v1232_v42 = vpop.f32.mrf.mxu1  ;;  %2393 = vmatprep.subr.bf16.mxu0 %v2497_v6 }
 0x34f   : > { %v1233_v44 = vadd.f32 %v2094_v30, %v1232_v42  ;;  %v1279_v48 = vpack.c.bf16 %v1241_v41, %v1238_v45 }
 0x350   : > { %v2343_v46 = vpop.f32.mrf.mxu1 }
 0x351   : > { %v1278_v47 = vpack.c.bf16 %v1233_v44, %v1230_v43  ;;  %v1254_v55 = vadd.f32 %v2343_v46, %v2094_v30  ;;  %2394 = vmatpush3.bf16.msra.mxu0 %v2497_v6  ;;  %v2504_v6 = vld [vmem:[%s2875_s15 + $0x18] sm:$0xff]  }
 0x352   : > { %v1245_v49 = vpop.f32.mrf.mxu1  ;;  %2395 = vmatprep.subr.bf16.mxu0 %v2498_v7 }
 0x353   : > { %2357 = vmatprep.mubr.msk.bf16.mxu0 %vm1303_vm5, %v1278_v47  ;;  %v1246_v53 = vadd.f32 %v2094_v30, %v1245_v49 }
 0x354   : > { %v2344_v50 = vpop.f32.mrf.mxu1  ;;  %2358 = vmatmul.mubr.msk.bf16.gmra.mxu0 %vm1303_vm5, %v1279_v48 }
 0x355   : > { %v1257_v51 = vadd.f32 %v2344_v50, %v2094_v30  ;;  %2396 = vmatpush3.bf16.msra.mxu0 %v2498_v7 }
 0x356   : > { %v1248_v52 = vpop.f32.mrf.mxu1 }
 0x357   : > { %v1249_v54 = vadd.f32 %v2094_v30, %v1248_v52  ;;  %v1281_v58 = vpack.c.bf16 %v1257_v51, %v1254_v55 }
 0x358   : > { %v2347_v56 = vpop.f32.mrf.mxu1 }
 0x359   : > { %v1280_v57 = vpack.c.bf16 %v1249_v54, %v1246_v53  ;;  %v1270_v1 = vadd.f32 %v2347_v56, %v2094_v30 }
 0x35a   : > { %v1261_v59 = vpop.f32.mrf.mxu1 }
 0x35b   : > { %2361 = vmatprep.mubr.msk.bf16.mxu0 %vm1303_vm5, %v1280_v57  ;;  %v1262_v63 = vadd.f32 %v2094_v30, %v1261_v59 }
 0x35c   : > { %v2348_v60 = vpop.f32.mrf.mxu1  ;;  %2362 = vmatmul.mubr.msk.bf16.gmra.mxu0 %vm1303_vm5, %v1281_v58 }
 0x35d   : > { %v1273_v61 = vadd.f32 %v2348_v60, %v2094_v30 }
 0x35e   : > { %v1264_v62 = vpop.f32.mrf.mxu1 }
 0x35f   : > { %v1265_v0 = vadd.f32 %v2094_v30, %v1264_v62  ;;  %v1283_v3 = vpack.c.bf16 %v1273_v61, %v1270_v1  ;;  %v2499_v1 = vld [vmem:[%s2873_s13] sm:$0xff]  }
 0x360   : > { %2397 = vmatprep.subr.bf16.mxu0 %v2499_v1 }
 0x361   : > { %v1282_v2 = vpack.c.bf16 %v1265_v0, %v1262_v63  ;;  %2398 = vmatpush3.bf16.msra.mxu0 %v2499_v1  ;;  %v2506_v1 = vld [vmem:[%s2875_s15 + $0x8] sm:$0xff]  }
 0x363   : > { %2365 = vmatprep.mubr.msk.bf16.mxu0 %vm1303_vm5, %v1282_v2  ;;  %v2500_v2 = vld [vmem:[%s2875_s15 + $0x38] sm:$0xff]  }
 0x364   : > { %2366 = vmatmul.mubr.msk.bf16.gmra.mxu0 %vm1303_vm5, %v1283_v3  ;;  %v2501_v3 = vld [vmem:[%s2875_s15 + $0x30] sm:$0xff]   ;;  %2415 = vmatprep.subr.bf16.mxu1 %v2500_v2 }
 0x40c   : > { %v2355_v8 = vpop.f32.mrf.mxu0 }
 0x40d   : > { %v1375_v14 = vadd.f32 %v2355_v8, %v2106_v10 }
 0x40e   : > { %v1366_v9 = vpop.f32.mrf.mxu0 }
 0x40f   : > { %v1367_v12 = vadd.f32 %v2106_v10, %v1366_v9  ;;  %v1431_v21 = vmax.f32 %v1375_v14, 0.0  ;;  %v2117_v9 = vld [vmem:[%s2872_s12] ss:$0 sm:$0xff] }
 0x410   : > { %v2356_v11 = vpop.f32.mrf.mxu0 }
 0x411   : > { %v1378_v13 = vadd.f32 %v2356_v11, %v2106_v10  ;;  %v1429_v19 = vmax.f32 %v1367_v12, 0.0 }
 0x412   : > { %v1369_v15 = vpop.f32.mrf.mxu0 }
 0x413   : > { %v1370_v16 = vadd.f32 %v2106_v10, %v1369_v15  ;;  %v1432_v17 = vmax.f32 %v1378_v13, 0.0 }
 0x414   : > { %v2359_v18 = vpop.f32.mrf.mxu0 }
 0x415   : > { %v1430_v20 = vmax.f32 %v1370_v16, 0.0  ;;  %v1446_v24 = vpack.c.bf16 %v1432_v17, %v1431_v21  ;;  %v1391_v28 = vadd.f32 %v2359_v18, %v2106_v10 }
 0x416   : > { %v1382_v22 = vpop.f32.mrf.mxu0 }
 0x417   : > { %v1445_v23 = vpack.c.bf16 %v1430_v20, %v1429_v19  ;;  %v1383_v26 = vadd.f32 %v2106_v10, %v1382_v22  ;;  %v1435_v35 = vmax.f32 %v1391_v28, 0.0 }
 0x418   : > { %v2360_v25 = vpop.f32.mrf.mxu0 }
 0x419   : > { %v1394_v27 = vadd.f32 %v2360_v25, %v2106_v10  ;;  %2375 = vmatprep.mubr.msk.bf16.mxu1 %vm1150_vm4, %v1445_v23  ;;  %v1433_v33 = vmax.f32 %v1383_v26, 0.0 }
 0x41a   : > { %v1385_v29 = vpop.f32.mrf.mxu0  ;;  %2376 = vmatmul.mubr.msk.bf16.vlgmr.msra.gmra.mxu1 %vm1150_vm4, %v1446_v24 }
 0x41b   : > { %v1386_v30 = vadd.f32 %v2106_v10, %v1385_v29  ;;  %v1436_v31 = vmax.f32 %v1394_v27, 0.0  ;;  %2416 = vmatpush3.bf16.msra.mxu1 %v2500_v2  ;;  %v2507_v2 = vld [vmem:[%s2875_s15] sm:$0xff]  }
 0x41c   : > { %v2363_v32 = vpop.f32.mrf.mxu0  ;;  %2417 = vmatprep.subr.bf16.mxu1 %v2501_v3 }
 0x41d   : > { %v1434_v34 = vmax.f32 %v1386_v30, 0.0  ;;  %v1448_v38 = vpack.c.bf16 %v1436_v31, %v1435_v35  ;;  %v1407_v42 = vadd.f32 %v2363_v32, %v2106_v10 }
 0x41e   : > { %v1398_v36 = vpop.f32.mrf.mxu0 }
 0x41f   : > { %v1447_v37 = vpack.c.bf16 %v1434_v34, %v1433_v33  ;;  %v1399_v40 = vadd.f32 %v2106_v10, %v1398_v36  ;;  %v1439_v49 = vmax.f32 %v1407_v42, 0.0  ;;  %2418 = vmatpush3.bf16.msra.mxu1 %v2501_v3 }
 0x420   : > { %v2364_v39 = vpop.f32.mrf.mxu0  ;;  %2419 = vmatprep.subr.bf16.mxu1 %v2502_v4 }
 0x421   : > { %v1410_v41 = vadd.f32 %v2364_v39, %v2106_v10  ;;  %2379 = vmatprep.mubr.msk.bf16.mxu1 %vm1150_vm4, %v1447_v37  ;;  %v1437_v47 = vmax.f32 %v1399_v40, 0.0 }
 0x422   : > { %v1401_v43 = vpop.f32.mrf.mxu0  ;;  %2380 = vmatmul.mubr.msk.bf16.gmra.mxu1 %vm1150_vm4, %v1448_v38 }
 0x423   : > { %v1402_v44 = vadd.f32 %v2106_v10, %v1401_v43  ;;  %v1440_v45 = vmax.f32 %v1410_v41, 0.0  ;;  %2420 = vmatpush3.bf16.msra.mxu1 %v2502_v4 }
 0x424   : > { %v2367_v46 = vpop.f32.mrf.mxu0  ;;  %2421 = vmatprep.subr.bf16.mxu1 %v2503_v5 }
 0x425   : > { %v1438_v48 = vmax.f32 %v1402_v44, 0.0  ;;  %v1450_v52 = vpack.c.bf16 %v1440_v45, %v1439_v49  ;;  %v1423_v56 = vadd.f32 %v2367_v46, %v2106_v10 }
 0x426   : > { %v1414_v50 = vpop.f32.mrf.mxu0 }
 0x427   : > { %v1449_v51 = vpack.c.bf16 %v1438_v48, %v1437_v47  ;;  %v1415_v54 = vadd.f32 %v2106_v10, %v1414_v50  ;;  %v1443_v62 = vmax.f32 %v1423_v56, 0.0  ;;  %2422 = vmatpush3.bf16.msra.mxu1 %v2503_v5  ;;  %v2129_v5 = vld [vmem:[%s2874_s14] ss:$0 sm:$0xff] }
 0x428   : > { %v2368_v53 = vpop.f32.mrf.mxu0  ;;  %2423 = vmatprep.subr.bf16.mxu1 %v2504_v6 }
 0x429   : > { %v1426_v55 = vadd.f32 %v2368_v53, %v2106_v10  ;;  %2383 = vmatprep.mubr.msk.bf16.mxu1 %vm1150_vm4, %v1449_v51  ;;  %v1441_v60 = vmax.f32 %v1415_v54, 0.0 }
 0x42a   : > { %v1417_v57 = vpop.f32.mrf.mxu0  ;;  %2384 = vmatmul.mubr.msk.bf16.gmra.mxu1 %vm1150_vm4, %v1450_v52 }
 0x42b   : > { %v1418_v58 = vadd.f32 %v2106_v10, %v1417_v57  ;;  %v1444_v59 = vmax.f32 %v1426_v55, 0.0  ;;  %2424 = vmatpush3.bf16.msra.mxu1 %v2504_v6 }
 0x42d   : > { %v1442_v61 = vmax.f32 %v1418_v58, 0.0  ;;  %v1452_v0 = vpack.c.bf16 %v1444_v59, %v1443_v62 }
 0x42f   : > { %v1451_v63 = vpack.c.bf16 %v1442_v61, %v1441_v60 }
 0x431   : > { %2387 = vmatprep.mubr.msk.bf16.mxu1 %vm1150_vm4, %v1451_v63 }
 0x432   : > { %2388 = vmatmul.mubr.msk.bf16.gmra.mxu1 %vm1150_vm4, %v1452_v0  ;;  %v2505_v0 = vld [vmem:[%s2875_s15 + $0x10] sm:$0xff]  }
 0x433   : > { %2425 = vmatprep.subr.bf16.mxu1 %v2505_v0 }
 0x434   : > { %2426 = vmatpush3.bf16.msra.mxu1 %v2505_v0 }
 0x435   : > { %2427 = vmatprep.subr.bf16.mxu1 %v2506_v1 }
 0x438   : > { %2428 = vmatpush3.bf16.msra.mxu1 %v2506_v1 }
 0x439   : > { %2429 = vmatprep.subr.bf16.mxu1 %v2507_v2 }
 0x43c   : > { %2430 = vmatpush3.bf16.msra.mxu1 %v2507_v2 }
 0x4da   : > { %v2377_v7 = vpop.f32.mrf.mxu1 }
 0x4db   : > { %v1550_v13 = vadd.f32 %v2377_v7, %v2117_v9 }
 0x4dc   : > { %v1541_v8 = vpop.f32.mrf.mxu1 }
 0x4dd   : > { %v1542_v11 = vadd.f32 %v2117_v9, %v1541_v8  ;;  %v1606_v20 = vmax.f32 %v1550_v13, 0.0 }
 0x4de   : > { %v2378_v10 = vpop.f32.mrf.mxu1 }
 0x4df   : > { %v1553_v12 = vadd.f32 %v2378_v10, %v2117_v9  ;;  %v1604_v18 = vmax.f32 %v1542_v11, 0.0 }
 0x4e0   : > { %v1544_v14 = vpop.f32.mrf.mxu1 }
 0x4e1   : > { %v1545_v15 = vadd.f32 %v2117_v9, %v1544_v14  ;;  %v1607_v16 = vmax.f32 %v1553_v12, 0.0 }
 0x4e2   : > { %v2381_v17 = vpop.f32.mrf.mxu1 }
 0x4e3   : > { %v1605_v19 = vmax.f32 %v1545_v15, 0.0  ;;  %v1621_v23 = vpack.c.bf16 %v1607_v16, %v1606_v20  ;;  %v1566_v27 = vadd.f32 %v2381_v17, %v2117_v9 }
 0x4e4   : > { %v1557_v21 = vpop.f32.mrf.mxu1 }
 0x4e5   : > { %v1620_v22 = vpack.c.bf16 %v1605_v19, %v1604_v18  ;;  %v1558_v25 = vadd.f32 %v2117_v9, %v1557_v21  ;;  %v1610_v34 = vmax.f32 %v1566_v27, 0.0 }
 0x4e6   : > { %v2382_v24 = vpop.f32.mrf.mxu1 }
 0x4e7   : > { %v1569_v26 = vadd.f32 %v2382_v24, %v2117_v9  ;;  %2399 = vmatprep.mubr.msk.bf16.mxu0 %vm977_vm2, %v1620_v22  ;;  %v1608_v32 = vmax.f32 %v1558_v25, 0.0 }
 0x4e8   : > { %v1560_v28 = vpop.f32.mrf.mxu1  ;;  %2400 = vmatmul.mubr.msk.bf16.vlgmr.msra.gmra.mxu0 %vm977_vm2, %v1621_v23 }
 0x4e9   : > { %v1561_v29 = vadd.f32 %v2117_v9, %v1560_v28  ;;  %v1611_v30 = vmax.f32 %v1569_v26, 0.0 }
 0x4ea   : > { %v2385_v31 = vpop.f32.mrf.mxu1 }
 0x4eb   : > { %v1609_v33 = vmax.f32 %v1561_v29, 0.0  ;;  %v1623_v37 = vpack.c.bf16 %v1611_v30, %v1610_v34  ;;  %v1582_v41 = vadd.f32 %v2385_v31, %v2117_v9 }
 0x4ec   : > { %v1573_v35 = vpop.f32.mrf.mxu1 }
 0x4ed   : > { %v1622_v36 = vpack.c.bf16 %v1609_v33, %v1608_v32  ;;  %v1574_v39 = vadd.f32 %v2117_v9, %v1573_v35  ;;  %v1614_v48 = vmax.f32 %v1582_v41, 0.0 }
 0x4ee   : > { %v2386_v38 = vpop.f32.mrf.mxu1 }
 0x4ef   : > { %v1585_v40 = vadd.f32 %v2386_v38, %v2117_v9  ;;  %2403 = vmatprep.mubr.msk.bf16.mxu0 %vm977_vm2, %v1622_v36  ;;  %v1612_v46 = vmax.f32 %v1574_v39, 0.0 }
 0x4f0   : > { %v1576_v42 = vpop.f32.mrf.mxu1  ;;  %2404 = vmatmul.mubr.msk.bf16.gmra.mxu0 %vm977_vm2, %v1623_v37 }
 0x4f1   : > { %v1577_v43 = vadd.f32 %v2117_v9, %v1576_v42  ;;  %v1615_v44 = vmax.f32 %v1585_v40, 0.0 }
 0x4f2   : > { %v2389_v45 = vpop.f32.mrf.mxu1 }
 0x4f3   : > { %v1613_v47 = vmax.f32 %v1577_v43, 0.0  ;;  %v1625_v51 = vpack.c.bf16 %v1615_v44, %v1614_v48  ;;  %v1598_v55 = vadd.f32 %v2389_v45, %v2117_v9 }
 0x4f4   : > { %v1589_v49 = vpop.f32.mrf.mxu1 }
 0x4f5   : > { %v1624_v50 = vpack.c.bf16 %v1613_v47, %v1612_v46  ;;  %v1590_v53 = vadd.f32 %v2117_v9, %v1589_v49  ;;  %v1618_v61 = vmax.f32 %v1598_v55, 0.0 }
 0x4f6   : > { %v2390_v52 = vpop.f32.mrf.mxu1 }
 0x4f7   : > { %v1601_v54 = vadd.f32 %v2390_v52, %v2117_v9  ;;  %2407 = vmatprep.mubr.msk.bf16.mxu0 %vm977_vm2, %v1624_v50  ;;  %v1616_v59 = vmax.f32 %v1590_v53, 0.0 }
 0x4f8   : > { %v1592_v56 = vpop.f32.mrf.mxu1  ;;  %2408 = vmatmul.mubr.msk.bf16.gmra.mxu0 %vm977_vm2, %v1625_v51 }
 0x4f9   : > { %v1593_v57 = vadd.f32 %v2117_v9, %v1592_v56  ;;  %v1619_v58 = vmax.f32 %v1601_v54, 0.0 }
 0x4fb   : > { %v1617_v60 = vmax.f32 %v1593_v57, 0.0  ;;  %v1627_v63 = vpack.c.bf16 %v1619_v58, %v1618_v61 }
 0x4fd   : > { %v1626_v62 = vpack.c.bf16 %v1617_v60, %v1616_v59  ;;  %v2142_v60 = vld [vmem:[%s2876_s16] ss:$0 sm:$0xff] }
 0x4ff   : > { %2411 = vmatprep.mubr.msk.bf16.mxu0 %vm977_vm2, %v1626_v62 }
 0x500   : > { %2412 = vmatmul.mubr.msk.bf16.gmra.mxu0 %vm977_vm2, %v1627_v63 }
 0x5a8   : > { %v2401_v3 = vpop.f32.mrf.mxu0 }
 0x5a9   : > { %v1734_v9 = vadd.f32 %v2401_v3, %v2129_v5 }
 0x5aa   : > { %v1725_v4 = vpop.f32.mrf.mxu0 }
 0x5ab   : > { %v1726_v7 = vadd.f32 %v2129_v5, %v1725_v4  ;;  %v1790_v16 = vmax.f32 %v1734_v9, 0.0 }
 0x5ac   : > { %v2402_v6 = vpop.f32.mrf.mxu0 }
 0x5ad   : > { %v1737_v8 = vadd.f32 %v2402_v6, %v2129_v5  ;;  %v1788_v14 = vmax.f32 %v1726_v7, 0.0 }
 0x5ae   : > { %v1728_v10 = vpop.f32.mrf.mxu0 }
 0x5af   : > { %v1729_v11 = vadd.f32 %v2129_v5, %v1728_v10  ;;  %v1791_v12 = vmax.f32 %v1737_v8, 0.0 }
 0x5b0   : > { %v2405_v13 = vpop.f32.mrf.mxu0 }
 0x5b1   : > { %v1789_v15 = vmax.f32 %v1729_v11, 0.0  ;;  %v1805_v19 = vpack.c.bf16 %v1791_v12, %v1790_v16  ;;  %v1750_v23 = vadd.f32 %v2405_v13, %v2129_v5 }
 0x5b2   : > { %v1741_v17 = vpop.f32.mrf.mxu0 }
 0x5b3   : > { %v1804_v18 = vpack.c.bf16 %v1789_v15, %v1788_v14  ;;  %v1742_v21 = vadd.f32 %v2129_v5, %v1741_v17  ;;  %v1794_v30 = vmax.f32 %v1750_v23, 0.0 }
 0x5b4   : > { %v2406_v20 = vpop.f32.mrf.mxu0 }
 0x5b5   : > { %v1753_v22 = vadd.f32 %v2406_v20, %v2129_v5  ;;  %2431 = vmatprep.mubr.bf16.mxu1 %v1804_v18  ;;  %v1792_v28 = vmax.f32 %v1742_v21, 0.0 }
 0x5b6   : > { %v1744_v24 = vpop.f32.mrf.mxu0  ;;  %2432 = vmatmul.mubr.bf16.vlgmr.msra.gmra.mxu1 %v1805_v19 }
 0x5b7   : > { %v1745_v25 = vadd.f32 %v2129_v5, %v1744_v24  ;;  %v1795_v26 = vmax.f32 %v1753_v22, 0.0 }
 0x5b8   : > { %v2409_v27 = vpop.f32.mrf.mxu0 }
 0x5b9   : > { %v1793_v29 = vmax.f32 %v1745_v25, 0.0  ;;  %v1807_v33 = vpack.c.bf16 %v1795_v26, %v1794_v30  ;;  %v1766_v37 = vadd.f32 %v2409_v27, %v2129_v5 }
 0x5ba   : > { %v1757_v31 = vpop.f32.mrf.mxu0 }
 0x5bb   : > { %v1806_v32 = vpack.c.bf16 %v1793_v29, %v1792_v28  ;;  %v1758_v35 = vadd.f32 %v2129_v5, %v1757_v31  ;;  %v1798_v44 = vmax.f32 %v1766_v37, 0.0 }
 0x5bc   : > { %v2410_v34 = vpop.f32.mrf.mxu0 }
 0x5bd   : > { %v1769_v36 = vadd.f32 %v2410_v34, %v2129_v5  ;;  %2435 = vmatprep.mubr.bf16.mxu1 %v1806_v32  ;;  %v1796_v42 = vmax.f32 %v1758_v35, 0.0 }
 0x5be   : > { %v1760_v38 = vpop.f32.mrf.mxu0  ;;  %2436 = vmatmul.mubr.bf16.gmra.mxu1 %v1807_v33 }
 0x5bf   : > { %v1761_v39 = vadd.f32 %v2129_v5, %v1760_v38  ;;  %v1799_v40 = vmax.f32 %v1769_v36, 0.0 }
 0x5c0   : > { %v2413_v41 = vpop.f32.mrf.mxu0 }
 0x5c1   : > { %v1797_v43 = vmax.f32 %v1761_v39, 0.0  ;;  %v1809_v47 = vpack.c.bf16 %v1799_v40, %v1798_v44  ;;  %v1782_v51 = vadd.f32 %v2413_v41, %v2129_v5 }
 0x5c2   : > { %v1773_v45 = vpop.f32.mrf.mxu0 }
 0x5c3   : > { %v1808_v46 = vpack.c.bf16 %v1797_v43, %v1796_v42  ;;  %v1774_v49 = vadd.f32 %v2129_v5, %v1773_v45  ;;  %v1802_v57 = vmax.f32 %v1782_v51, 0.0 }
 0x5c4   : > { %v2414_v48 = vpop.f32.mrf.mxu0 }
 0x5c5   : > { %v1785_v50 = vadd.f32 %v2414_v48, %v2129_v5  ;;  %2439 = vmatprep.mubr.bf16.mxu1 %v1808_v46  ;;  %v1800_v55 = vmax.f32 %v1774_v49, 0.0 }
 0x5c6   : > { %v1776_v52 = vpop.f32.mrf.mxu0  ;;  %2440 = vmatmul.mubr.bf16.gmra.mxu1 %v1809_v47 }
 0x5c7   : > { %v1777_v53 = vadd.f32 %v2129_v5, %v1776_v52  ;;  %v1803_v54 = vmax.f32 %v1785_v50, 0.0 }
 0x5c9   : > { %v1801_v56 = vmax.f32 %v1777_v53, 0.0  ;;  %v1811_v59 = vpack.c.bf16 %v1803_v54, %v1802_v57 }
 0x5cb   : > { %v1810_v58 = vpack.c.bf16 %v1801_v56, %v1800_v55 }
 0x5cd   : > { %2443 = vmatprep.mubr.bf16.mxu1 %v1810_v58 }
 0x5ce   : > { %2444 = vmatmul.mubr.bf16.gmra.mxu1 %v1811_v59 }
 0x676   : > { %v2433_v61 = vpop.f32.mrf.mxu1 }
 0x677   : > { %v1926_v62 = vadd.f32 %v2433_v61, %v2142_v60 }
 0x678   : > { %v1917_v63 = vpop.f32.mrf.mxu1 }
 0x679   : > { %1982 = vst.msk [vmem:[%s2823_s0 + $0x10] sm:$0xff] %vm600_vm0, %v1926_v62  ;;  %v1918_v0 = vadd.f32 %v2142_v60, %v1917_v63 }
 0x67a   : > { %v2434_v1 = vpop.f32.mrf.mxu1 }
 0x67b   : > { %1980 = vst.msk [vmem:[%s2823_s0] sm:$0xff] %vm600_vm0, %v1918_v0  ;;  %v1929_v2 = vadd.f32 %v2434_v1, %v2142_v60 }
 0x67c   : > { %v1920_v3 = vpop.f32.mrf.mxu1 }
 0x67d   : > { %1983 = vst.msk [vmem:[%s2823_s0 + $0x18] sm:$0xff] %vm600_vm0, %v1929_v2  ;;  %v1921_v4 = vadd.f32 %v2142_v60, %v1920_v3 }
 0x67e   : > { %v2437_v5 = vpop.f32.mrf.mxu1 }
 0x67f   : > { %1981 = vst.msk [vmem:[%s2823_s0 + $0x8] sm:$0xff] %vm600_vm0, %v1921_v4  ;;  %v1942_v6 = vadd.f32 %v2437_v5, %v2142_v60 }
 0x680   : > { %v1933_v7 = vpop.f32.mrf.mxu1 }
 0x681   : > { %1986 = vst.msk [vmem:[%s2823_s0 + $0x30] sm:$0xff] %vm600_vm0, %v1942_v6  ;;  %v1934_v8 = vadd.f32 %v2142_v60, %v1933_v7 }
 0x682   : > { %v2438_v9 = vpop.f32.mrf.mxu1 }
 0x683   : > { %1984 = vst.msk [vmem:[%s2823_s0 + $0x20] sm:$0xff] %vm600_vm0, %v1934_v8  ;;  %v1945_v10 = vadd.f32 %v2438_v9, %v2142_v60 }
 0x684   : > { %v1936_v11 = vpop.f32.mrf.mxu1 }
 0x685   : > { %1987 = vst.msk [vmem:[%s2823_s0 + $0x38] sm:$0xff] %vm600_vm0, %v1945_v10  ;;  %v1937_v12 = vadd.f32 %v2142_v60, %v1936_v11 }
 0x686   : > { %v2441_v13 = vpop.f32.mrf.mxu1 }
 0x687   : > { %1985 = vst.msk [vmem:[%s2823_s0 + $0x28] sm:$0xff] %vm600_vm0, %v1937_v12  ;;  %v1958_v14 = vadd.f32 %v2441_v13, %v2142_v60 }
 0x688   : > { %v1949_v15 = vpop.f32.mrf.mxu1 }
 0x689   : > { %1990 = vst.msk [vmem:[%s2823_s0 + $0x50] sm:$0xff] %vm600_vm0, %v1958_v14  ;;  %v1950_v16 = vadd.f32 %v2142_v60, %v1949_v15 }
 0x68a   : > { %v2442_v17 = vpop.f32.mrf.mxu1 }
 0x68b   : > { %1988 = vst.msk [vmem:[%s2823_s0 + $0x40] sm:$0xff] %vm600_vm0, %v1950_v16  ;;  %v1961_v18 = vadd.f32 %v2442_v17, %v2142_v60 }
 0x68c   : > { %v1952_v19 = vpop.f32.mrf.mxu1 }
 0x68d   : > { %1991 = vst.msk [vmem:[%s2823_s0 + $0x58] sm:$0xff] %vm600_vm0, %v1961_v18  ;;  %v1953_v20 = vadd.f32 %v2142_v60, %v1952_v19 }
 0x68e   : > { %v2445_v21 = vpop.f32.mrf.mxu1 }
 0x68f   : > { %1989 = vst.msk [vmem:[%s2823_s0 + $0x48] sm:$0xff] %vm600_vm0, %v1953_v20  ;;  %v1974_v22 = vadd.f32 %v2445_v21, %v2142_v60 }
 0x690   : > { %v1965_v23 = vpop.f32.mrf.mxu1 }
 0x691   : > { %1994 = vst.msk [vmem:[%s2823_s0 + $0x70] sm:$0xff] %vm600_vm0, %v1974_v22  ;;  %v1966_v24 = vadd.f32 %v2142_v60, %v1965_v23 }
 0x692   : > { %v2446_v25 = vpop.f32.mrf.mxu1 }
 0x693   : > { %1992 = vst.msk [vmem:[%s2823_s0 + $0x60] sm:$0xff] %vm600_vm0, %v1966_v24  ;;  %v1977_v26 = vadd.f32 %v2446_v25, %v2142_v60 }
 0x694   : > { %v1968_v27 = vpop.f32.mrf.mxu1 }
 0x695   : > { %1995 = vst.msk [vmem:[%s2823_s0 + $0x78] sm:$0xff] %vm600_vm0, %v1977_v26  ;;  %v1969_v28 = vadd.f32 %v2142_v60, %v1968_v27 }
 0x697   : > { %1993 = vst.msk [vmem:[%s2823_s0 + $0x68] sm:$0xff] %vm600_vm0, %v1969_v28 }
 0x698 PF: > { %s27_s24 = sadd.s32 1, %s2514_s24  }
 0x699   : > { %p24_p4 = scmp.ge.s32.totalorder %s27_s24, 4  }
 0x69b   :  { %26 = sbr.rel (!%p24_p4) target bundleno = 3 (0x3), region = 118 }

</bundles_post_ra>
